<compile_context>
chip_gen: v6e
topology: v6e:2x2x1
jax: 0.10.0
libtpu: 0.0.40
codegen_flags: <defaults>
</compile_context>

<pallas_src>
import jax
import jax.numpy as jnp
from jax.experimental import pallas as pl
from jax.experimental.pallas import tpu as pltpu


def _pick_tile(dim, target, align):
    """Largest tile <= target that divides dim and is `align`-aligned, or the full dim."""
    if dim <= target:
        return dim
    t = (target // align) * align
    while t >= align:
        if dim % t == 0:
            return t
        t -= align
    return dim


def _attention_tile_target():
    # Review: 256-wide tiles fill the v6e/v7x MXU; keep 128 on v5e.
    try:
        kind = jax.devices()[0].device_kind.lower()
    except Exception:
        return 256
    if ("v5e" in kind) or ("v5 lite" in kind) or ("v5lite" in kind):
        return 128
    return 256


# --------------------------------------------------------------------------------------
# Stage 1: plain tiled linear kernel (used for the QKV projection, run once).
# --------------------------------------------------------------------------------------
def linear_kernel(x_ref, w_ref, b_ref, o_ref):
    # x: (TM, K) bf16, w: (K, TN) bf16, b: (1, TN) f32 -> o: (TM, TN)
    acc = jnp.dot(x_ref[...], w_ref[...], preferred_element_type=jnp.float32)
    o_ref[...] = (acc + b_ref[...]).astype(o_ref.dtype)


def linear(x, w, b, out_dtype, tm_target=256, tn_target=512):
    M, K = x.shape
    _, N = w.shape
    TM = _pick_tile(M, tm_target, 8)       # second-minor: 8-aligned or full
    TN = _pick_tile(N, tn_target, 128)     # minor: 128-aligned or full
    grid = (M // TM, N // TN)
    return pl.pallas_call(
        linear_kernel,
        out_shape=jax.ShapeDtypeStruct((M, N), out_dtype),
        grid=grid,
        in_specs=[
            pl.BlockSpec((TM, K), lambda i, j: (i, 0)),
            pl.BlockSpec((K, TN), lambda i, j: (0, j)),
            pl.BlockSpec((1, TN), lambda i, j: (0, j)),
        ],
        out_specs=pl.BlockSpec((TM, TN), lambda i, j: (i, j)),
        compiler_params=pltpu.CompilerParams(
            dimension_semantics=("parallel", "parallel")),
    )(x, w, b.reshape(1, N))


# --------------------------------------------------------------------------------------
# Stage 2: flash attention over pre-projected q/k/v, output projection fused at finalize.
# --------------------------------------------------------------------------------------
def flash_mha_kernel(q_ref, k_ref, v_ref, wo_ref, bo_ref, o_ref,
                     m_sc, l_sc, acc_sc):
    # q_ref:  (1, H, TQ, D) bf16     k_ref/v_ref: (1, H, TK, D) bf16
    # wo_ref: (H, D, E) bf16         bo_ref: (1, E) f32
    # o_ref:  (1, TQ, E)             m_sc/l_sc: (H, TQ, 1) f32, acc_sc: (H, TQ, D) f32
    #
    # TODO(synk): for tiny head dims (e.g. the D=8 test shape) pack heads along the lane
    # axis ((TQ, H*D) layout) to fill the MXU; current layout batches over H with D-wide
    # contractions.
    ki = pl.program_id(2)

    @pl.when(ki == 0)
    def _init():
        m_sc[...] = jnp.full(m_sc.shape, -1e30, dtype=m_sc.dtype)
        l_sc[...] = jnp.zeros(l_sc.shape, dtype=l_sc.dtype)
        acc_sc[...] = jnp.zeros(acc_sc.shape, dtype=acc_sc.dtype)

    q = q_ref[0]      # (H, TQ, D) bf16; 1/sqrt(D) already folded into the Q projection
    k = k_ref[0]      # (H, TK, D) bf16
    v = v_ref[0]      # (H, TK, D) bf16

    # Head-batched QK^T: contract head_dim of q and k directly (no explicit transpose).
    s = jnp.einsum('hqd,hkd->hqk', q, k,
                   preferred_element_type=jnp.float32)           # (H, TQ, TK) f32

    # Online (flash) softmax update; f32 math (v5e-safe).
    # TODO(synk): on v6e/v7x the exp could run in bf16 (packed EUP, ~2x) with f32 m/l.
    m_prev = m_sc[...]
    m_new = jnp.maximum(m_prev, jnp.max(s, axis=-1, keepdims=True))
    alpha = jnp.exp(m_prev - m_new)
    p = jnp.exp(s - m_new)                                       # (H, TQ, TK)
    l_sc[...] = alpha * l_sc[...] + jnp.sum(p, axis=-1, keepdims=True)
    acc_sc[...] = alpha * acc_sc[...] + jnp.einsum(
        'hqk,hkd->hqd', p.astype(jnp.bfloat16), v,
        preferred_element_type=jnp.float32)                      # (H, TQ, D)
    m_sc[...] = m_new

    # TODO(synk): attention-weight dropout omitted (eval identity); mask=None path only.
    @pl.when(ki == pl.num_programs(2) - 1)
    def _finalize():
        H, TQ, D = acc_sc.shape
        E = wo_ref.shape[-1]
        o_heads = acc_sc[...] * pl.reciprocal(l_sc[...], approx=True)   # (H, TQ, D) f32
        # Output projection with the head merge folded in: accumulate per-head
        # (TQ, D) @ (D, E) contributions into one (TQ, E) f32 block.  No (H, TQ, E)
        # temporary, no concat of narrow head slices, one lane-dense store.
        # TODO(synk): when D % 128 == 0, replace with a single (TQ, H*D) @ (E, E) matmul.
        out = jnp.zeros((TQ, E), dtype=jnp.float32)
        for h in range(H):   # static unroll; runs once per (b, qi) tile
            out = out + jnp.dot(o_heads[h].astype(jnp.bfloat16), wo_ref[h],
                                preferred_element_type=jnp.float32)
        o_ref[0] = (out + bo_ref[...]).astype(o_ref.dtype)


def multi_head_attention(query, w_qkv, b_qkv, w_out, b_out, num_heads):
    """query: (B, S, E). w_qkv: (E, 3E) (y = x @ W + b layout), b_qkv: (3E,),
    w_out: (E, E), b_out: (E,). Matches the PyTorch module's eval forward
    (key/value args are ignored by the module, dropout is identity, mask=None)."""
    B, S, E = query.shape
    H = num_heads
    D = E // H
    assert H * D == E
    scale = float(D) ** 0.5
    bf16 = jnp.bfloat16

    # Host-side weight prep: fold 1/sqrt(D) into the Q projection; per-head rows of w_out.
    w_qkv_s = jnp.concatenate([w_qkv[:, :E] / scale, w_qkv[:, E:]], axis=1)
    b_qkv_s = jnp.concatenate([b_qkv[:E] / scale, b_qkv[E:]])
    wo = w_out.reshape(H, D, E)
    bo = b_out.reshape(1, E)

    # --- Stage 1: QKV projection once, as a single lane-dense matmul (Pallas). ---
    x2d = query.reshape(B * S, E).astype(bf16)
    qkv = linear(x2d, w_qkv_s.astype(bf16), b_qkv_s.astype(jnp.float32),
                 out_dtype=bf16)                                  # (B*S, 3E) bf16

    # Split / head layout in XLA (pure data movement, done once, review-sanctioned).
    qkv = qkv.reshape(B, S, 3, H, D)
    q = jnp.transpose(qkv[:, :, 0], (0, 2, 1, 3))                 # (B, H, S, D)
    k = jnp.transpose(qkv[:, :, 1], (0, 2, 1, 3))
    v = jnp.transpose(qkv[:, :, 2], (0, 2, 1, 3))

    # --- Stage 2: flash attention + fused output projection (Pallas). ---
    tile_target = _attention_tile_target()
    TQ = _pick_tile(S, tile_target, 8)
    TK = _pick_tile(S, tile_target, 8)
    assert S % TQ == 0 and S % TK == 0
    grid = (B, S // TQ, S // TK)

    return pl.pallas_call(
        flash_mha_kernel,
        out_shape=jax.ShapeDtypeStruct((B, S, E), query.dtype),
        grid_spec=pltpu.PrefetchScalarGridSpec(
            num_scalar_prefetch=0,
            grid=grid,
            in_specs=[
                pl.BlockSpec((1, H, TQ, D), lambda b, qi, ki: (b, 0, qi, 0)),  # q tile
                pl.BlockSpec((1, H, TK, D), lambda b, qi, ki: (b, 0, ki, 0)),  # k tile
                pl.BlockSpec((1, H, TK, D), lambda b, qi, ki: (b, 0, ki, 0)),  # v tile
                # Only the (small) output-projection weights remain resident; the qkv
                # weights never enter this kernel anymore.
                # TODO(synk): single-buffer wo/bo (constant block index) or DMA them once
                # from HBM when E is large, to save VMEM on v7x's 64 MiB/TC.
                pl.BlockSpec((H, D, E), lambda b, qi, ki: (0, 0, 0)),          # w_out
                pl.BlockSpec((1, E), lambda b, qi, ki: (0, 0)),                # b_out
            ],
            out_specs=pl.BlockSpec((1, TQ, E), lambda b, qi, ki: (b, qi, 0)),
            scratch_shapes=[
                pltpu.VMEM((H, TQ, 1), jnp.float32),   # running max
                pltpu.VMEM((H, TQ, 1), jnp.float32),   # running denominator
                pltpu.VMEM((H, TQ, D), jnp.float32),   # running numerator
            ],
        ),
        compiler_params=pltpu.CompilerParams(
            dimension_semantics=("parallel", "parallel", "arbitrary"),
            # Ample for this kernel (projections removed; only the (E,E) out-proj weights
            # plus streamed q/k/v tiles live in VMEM); safe on v5e/v6e/v7x.
            vmem_limit_bytes=32 * 1024 * 1024,
        ),
    )(q, k, v, wo.astype(bf16), bo.astype(jnp.float32))


def reference_mha(query, w_qkv, b_qkv, w_out, b_out, num_heads):
    B, S, E = query.shape
    D = E // num_heads
    qkv = query @ w_qkv + b_qkv                                    # (B, S, 3E)
    qkv = qkv.reshape(B, S, 3, num_heads, D)
    q, k, v = qkv[:, :, 0], qkv[:, :, 1], qkv[:, :, 2]             # (B, S, H, D)
    q, k, v = [jnp.transpose(t, (0, 2, 1, 3)) for t in (q, k, v)]  # (B, H, S, D)
    attn = jnp.einsum("bhqd,bhkd->bhqk", q, k) / jnp.sqrt(jnp.float32(D))
    attn = jax.nn.softmax(attn, axis=-1)
    out = jnp.einsum("bhqk,bhkd->bhqd", attn, v)                   # (B, H, S, D)
    out = jnp.transpose(out, (0, 2, 1, 3)).reshape(B, S, E)
    return out @ w_out + b_out


if __name__ == "__main__":
    # Small deterministic config consistent with the module.
    batch, seq_len, embed_size, num_heads = 2, 8, 32, 4
    dropout = 0.0  # eval / identity

    key = jax.random.PRNGKey(0)
    k_x, k_wq, k_bq, k_wo, k_bo = jax.random.split(key, 5)

    x = jax.random.normal(k_x, (batch, seq_len, embed_size), dtype=jnp.float32)

    # Parameters stored pre-transposed so that y = x @ W + b (W == torch_weight.T).
    w_qkv = 0.02 * jax.random.normal(k_wq, (embed_size, 3 * embed_size), jnp.float32)
    b_qkv = 0.02 * jax.random.normal(k_bq, (3 * embed_size,), jnp.float32)
    w_out = 0.02 * jax.random.normal(k_wo, (embed_size, embed_size), jnp.float32)
    b_out = 0.02 * jax.random.normal(k_bo, (embed_size,), jnp.float32)

    out = multi_head_attention(x, w_qkv, b_qkv, w_out, b_out, num_heads)
    out = jax.block_until_ready(out)

    ref = reference_mha(x, w_qkv, b_qkv, w_out, b_out, num_heads)
    assert out.shape == (batch, seq_len, embed_size)
    # bf16 MXU operands (f32 accumulation) => looser tolerance than pure f32.
    assert jnp.allclose(out, ref, atol=2e-2, rtol=2e-2), "mismatch vs reference"

    print("KERNEL_OK")
</pallas_src>

<mosaic_0001>
module attributes {stable_mosaic.version = 11 : i64} {
  func.func @linear_kernel(%arg0: i32, %arg1: i32, %arg2: memref<16x32xbf16, #tpu.memory_space<vmem>>, %arg3: memref<32x96xbf16, #tpu.memory_space<vmem>>, %arg4: memref<1x96xf32, #tpu.memory_space<vmem>>, %arg5: memref<16x96xbf16, #tpu.memory_space<vmem>>) attributes {dimension_semantics = [#tpu.dimension_semantics<parallel>, #tpu.dimension_semantics<parallel>], iteration_bounds = array<i64: 1, 1>, scalar_prefetch = 0 : i64, scratch_operands = 0 : i64, tpu.core_type = #tpu.core_type<tc>, window_params = [{transform_indices = @transform_0, window_bounds = array<i64: 16, 32>}, {transform_indices = @transform_1, window_bounds = array<i64: 32, 96>}, {transform_indices = @transform_2, window_bounds = array<i64: 1, 96>}, {transform_indices = @transform_3, window_bounds = array<i64: 16, 96>}]} {
    %c0 = arith.constant 0 : index
    %c0_0 = arith.constant 0 : index
    %0 = vector.load %arg2[%c0, %c0_0] : memref<16x32xbf16, #tpu.memory_space<vmem>>, vector<16x32xbf16>
    %c0_1 = arith.constant 0 : index
    %c0_2 = arith.constant 0 : index
    %1 = vector.load %arg3[%c0_1, %c0_2] : memref<32x96xbf16, #tpu.memory_space<vmem>>, vector<32x96xbf16>
    %cst = arith.constant dense<0.000000e+00> : vector<16x96xf32>
    %2 = tpu.matmul %0, %1, %cst {dimension_numbers = #tpu.dot_dimension_numbers<[1], [0], [0], [1], [0, 0, 1, 1], [], []>} : vector<16x32xbf16>, vector<32x96xbf16>, vector<16x96xf32> -> vector<16x96xf32>
    %c0_3 = arith.constant 0 : index
    %c0_4 = arith.constant 0 : index
    %3 = vector.load %arg4[%c0_3, %c0_4] : memref<1x96xf32, #tpu.memory_space<vmem>>, vector<1x96xf32>
    %4 = vector.broadcast %3 : vector<1x96xf32> to vector<16x96xf32>
    %5 = arith.addf %2, %4 : vector<16x96xf32>
    %6 = arith.truncf %5 : vector<16x96xf32> to vector<16x96xbf16>
    %c0_5 = arith.constant 0 : index
    %c0_6 = arith.constant 0 : index
    %7 = vector.load %arg5[%c0_5, %c0_6] : memref<16x96xbf16, #tpu.memory_space<vmem>>, vector<16x96xbf16>
    tpu.vector_store %arg5[%c0_5, %c0_6], %6 {strides = array<i32>} : memref<16x96xbf16, #tpu.memory_space<vmem>>, vector<16x96xbf16>,
    return
  }
  func.func @transform_0(%arg0: i32, %arg1: i32) -> (i32, i32) {
    %c0_i32 = arith.constant 0 : i32
    %c0_i32_0 = arith.constant 0 : i32
    return %arg0, %c0_i32 : i32, i32
  }
  func.func @transform_1(%arg0: i32, %arg1: i32) -> (i32, i32) {
    %c0_i32 = arith.constant 0 : i32
    %c0_i32_0 = arith.constant 0 : i32
    return %c0_i32, %arg1 : i32, i32
  }
  func.func @transform_2(%arg0: i32, %arg1: i32) -> (i32, i32) {
    %c0_i32 = arith.constant 0 : i32
    %c0_i32_0 = arith.constant 0 : i32
    return %c0_i32, %arg1 : i32, i32
  }
  func.func @transform_3(%arg0: i32, %arg1: i32) -> (i32, i32) {
    %c0_i32 = arith.constant 0 : i32
    return %arg0, %arg1 : i32, i32
  }
}

</mosaic_0001>

<bundles_post_ra>
// kernel: tpu_custom_call.1
= control target key start
LH: loop header
LB: loop body
LE: loop exit
PB: predicated region body
PF: predicated region fallthrough
CT: control target
= control target key end

     0   :  { %8 = vsyncpa [#allocation3], 0  ;;  %s292_s0 = inlined_call_operand.hbm [shape: bf16[16,32], index: 0, kind: input, shape index: {}]   ;;  %s293_s1 = inlined_call_operand.hbm [shape: bf16[32,96], index: 1, kind: input, shape index: {}]   ;;  %s294_s2 = inlined_call_operand.vmem [shape: f32[1,96], index: 2, kind: input, shape index: {}]   ;;  %s295_s3 = inlined_call_operand.hbm [shape: bf16[16,96], index: 3, kind: output, shape index: {}]  }
   0x1   :  { %9 = vsyncpa [#allocation6], 0 }
   0x2   :  { %10 = vsyncpa [#allocation4], 0  ;;  %s244_s12 = smov [#allocation2]  }
   0x3   :  { %s16_s13 = sshll.u32 %s244_s12, 4  ;;  %s17_s13 = int_to_ptr.vmem [resolvable:$true] %s16_s13 }
   0x4   :  { %s186_s14 = scalar_lea.vmem %s17_s13, 128  ;;  %p191_p1 = scmp.lt.s32.totalorder %s17_s13, %s17_s13 }
   0x5   :  { %p187_p0 = scmp.ne.s32.totalorder %s17_s13, %s186_s14  ;;  %p192_p2 = scmp.lt.s32.totalorder %s186_s14, %s186_s14 }
   0x7   :  { %p193_p3 = por %p192_p2, %p191_p1 }
   0x9   :  { %p194_p4 = pnand %p193_p3, %p187_p0 }
   0xb   :  { %197 = shalt.err (!%p194_p4)
}
   0xc   :  { %s245_s15 = smov 64   ;;  %s246_s16 = smov 4  }
   0xd   :  { %22 = dma.hbm_to_vmem [thread:$0]  %s292_s0, 128, %s17_s13, [#allocation3], %s245_s15, %s245_s15, %s246_s16  }
   0xe   :  { %s247_s19 = smov [#allocation5]  }
   0xf   :  { %s28_s20 = sshll.u32 %s247_s19, 4  ;;  %s29_s20 = int_to_ptr.vmem [resolvable:$true] %s28_s20 }
  0x10   :  { %s206_s21 = scalar_lea.vmem %s29_s20, 256  ;;  %p211_p6 = scmp.lt.s32.totalorder %s29_s20, %s29_s20 }
  0x11   :  { %p207_p5 = scmp.ne.s32.totalorder %s29_s20, %s206_s21  ;;  %p212_p7 = scmp.lt.s32.totalorder %s206_s21, %s206_s21 }
  0x13   :  { %p213_p8 = por %p212_p7, %p211_p6 }
  0x15   :  { %p214_p9 = pnand %p213_p8, %p207_p5 }
  0x17   :  { %217 = shalt.err (!%p214_p9)
}
  0x18   :  { %34 = dma.hbm_to_vmem [thread:$0]  %s293_s1, 256, %s29_s20, [#allocation6], %s245_s15, %s245_s15, %s246_s16  }
  0x19   :  { %238 = dma.done.wait [#allocation3], 128  }
  0x1a   :  { %239 = vsyncadd [#allocation3], 4294967168 }
  0x1b   :  { %240 = dma.done.wait [#allocation6], 256  }
  0x1c   :  { %241 = vsyncadd [#allocation6], 4294967040  ;;  %v248_v0 = vmov 0.0   ;;  %vm249_vm0 = vmmov 0   ;;  %v175_v1 = vld [vmem:[#allocation5 + $0x8] sm:$0xff]   ;;  %v176_v2 = vld [vmem:[#allocation5] sm:$0xff]  }
  0x1d   :  { %160 = vmatprep.subr.bf16.mxu0 %v248_v0  ;;  %164 = vmatprep.mubr.msk.bf16.mxu0 %vm249_vm0, %v248_v0  ;;  %v177_v3 = vld [vmem:[#allocation2] sm:$0xff]   ;;  %vm74_vm1 = vcmask 261120   ;;  %vm127_vm2 = vcmask 781312   ;;  %s250_s1 = smov [#allocation7]  }
  0x1e   :  { %161 = vmatpush3.bf16.msra.mxu0 %v175_v1  ;;  %v148_v4 = vld [vmem:[%s294_s2] ss:$0 sm:$0xff]  ;;  %s135_s25 = sshll.u32 %s250_s1, 4  ;;  %s136_s25 = int_to_ptr.vmem [resolvable:$true] %s135_s25 }
  0x1f   :  { %162 = vmatprep.subr.bf16.mxu0 %v248_v0  ;;  %s218_s26 = scalar_lea.vmem %s136_s25, 128  ;;  %p223_p11 = scmp.lt.s32.totalorder %s136_s25, %s136_s25 }
  0x20   :  { %p219_p10 = scmp.ne.s32.totalorder %s136_s25, %s218_s26  ;;  %p224_p12 = scmp.lt.s32.totalorder %s218_s26, %s218_s26 }
  0x22   :  { %163 = vmatpush3.bf16.msra.mxu0 %v176_v2  ;;  %p225_p13 = por %p224_p12, %p223_p11 }
  0x24   :  { %p226_p0 = pnand %p225_p13, %p219_p10 }
  0x25   :  { %165 = vmatmul.mubr.msk.bf16.vlgmr.msra.gmra.mxu0 %vm74_vm1, %v177_v3 }
  0xe5   :  { %v112_v5 = vpop.f32.mrf.mxu0 }
  0xe6   :  { %v113_v6 = vadd.f32 %v148_v4, %v112_v5 }
  0xe7   :  { %v166_v7 = vpop.f32.mrf.mxu0 }
  0xe8   :  { %v155_v8 = vpack.c.bf16 %v113_v6, %v113_v6 }
  0xe9   :  { %v115_v9 = vpop.f32.mrf.mxu0 }
  0xea   :  { %v116_v10 = vadd.f32 %v148_v4, %v115_v9  ;;  %128 = vst.msk [vmem:[#allocation7] sm:$0xf] %vm127_vm2, %v155_v8 }
  0xeb   :  { %v167_v11 = vpop.f32.mrf.mxu0 }
  0xec   :  { %v156_v12 = vpack.c.bf16 %v116_v10, %v116_v10 }
  0xee   :  { %129 = vst.msk [vmem:[#allocation7 + $0x4] sm:$0xf] %vm127_vm2, %v156_v12 }
  0xef   :  { %229 = shalt.err (!%p226_p0)
}
  0xf0   :  { %141 = dma.vmem_to_hbm [thread:$0]  %s136_s25, 128, %s295_s3, [#allocation4], %s245_s15, %s245_s15, %s246_s16  }
  0xf1   :  { %242 = dma.done.wait [#allocation4], 128  }
  0xf2   :  { %243 = vsyncadd [#allocation4], 4294967168 }
  0xf3   :  { %145 = vsyncpa [#allocation3], 1 }
  0xf4   :  { %146 = vsyncpa [#allocation6], 1 }
  0xf5   :  { %147 = vsyncpa [#allocation4], 1 }

</bundles_post_ra>
